<compile_context>
chip_gen: v6e
topology: v6e:2x2x1
jax: 0.10.0
libtpu: 0.0.40
codegen_flags: <defaults>
</compile_context>

<pallas_src>
import functools

import jax
import jax.numpy as jnp
from jax.experimental import pallas as pl
from jax.experimental.pallas import tpu as pltpu


# ---------------------------------------------------------------------------
# Fused kernel: normalize weight tile + bf16 cosine matmul + margin scatter + scale
# ---------------------------------------------------------------------------
def _ecosface_kernel(xn_ref, w_ref, lab_ref, marg_ref, o_ref, *, s):
    xn = xn_ref[...]                                  # (tb, E) f32, pre-normalized
    w = w_ref[...].astype(jnp.float32)                # (tc, E) one class tile

    # F.normalize(w, dim=1) == w * rsqrt(max(||w||^2, 1e-24))   (f32 for accuracy)
    inv_wn = jax.lax.rsqrt(
        jnp.maximum(jnp.sum(w * w, axis=-1, keepdims=True), jnp.float32(1e-24)))
    wn = w * inv_wn

    # MXU matmul: bf16 inputs, f32 accumulation; contract dim 1 of BOTH operands
    # (no explicit transpose / XLU).
    cos = jax.lax.dot_general(
        xn.astype(jnp.bfloat16), wn.astype(jnp.bfloat16),
        dimension_numbers=(((1,), (1,)), ((), ())),
        preferred_element_type=jnp.float32)           # (tb, tc)

    # Fused epilogue: m_hot.scatter_(1, labels, margin); (cos - m_hot) * s.
    # Class axis is grid axis 0; shift the (tb,1) labels instead of the big iota.
    tb, tc = o_ref.shape
    lab_local = lab_ref[...] - pl.program_id(0) * tc          # (tb, 1)
    col = jax.lax.broadcasted_iota(jnp.int32, (tb, tc), 1)    # local class index
    m_hot = jnp.where(col == lab_local, marg_ref[...], jnp.float32(0.0))
    o_ref[...] = (cos - m_hot) * jnp.float32(s)


# ---------------------------------------------------------------------------
# Tile selection under an explicit VMEM budget
# ---------------------------------------------------------------------------
_VMEM_TILE_BUDGET = 40 * 1024 * 1024      # tile-picking budget (fits v7x 64 MiB)
_VMEM_LIMIT_BYTES = 56 * 1024 * 1024      # scoped limit (lifts v5e's 16 MiB default)


def _vmem_bytes(tb, tc, E):
    # Double-buffered f32 xn / weight / output tiles + tiny label/margin tiles.
    return 2 * 4 * (tb * E + tc * E + tb * tc) + 4 * 4 * tb


def _pick_tiles(B, C, E):
    # Biggest batch tile first (fewest weight streams), then biggest class tile.
    tb_opts = [B] + [t for t in (1024, 512, 256, 128, 64, 32, 16, 8)
                     if t < B and B % t == 0]
    tc_opts = [t for t in (512, 256, 128) if t <= C and C % t == 0] or [C]
    for tb in tb_opts:
        for tc in tc_opts:
            if _vmem_bytes(tb, tc, E) <= _VMEM_TILE_BUDGET:
                return tb, tc
    return tb_opts[-1], tc_opts[-1]


def ecosface_fused(xn, weight, labels, margin, *, s, tb=None, tc=None):
    """(normalize(W) @ xn.T).T cosine logits with fused margin/scale epilogue."""
    B, E = xn.shape
    C, _ = weight.shape
    auto_tb, auto_tc = _pick_tiles(B, C, E)
    tb = auto_tb if tb is None else tb
    tc = auto_tc if tc is None else tc
    assert B % tb == 0 and C % tc == 0

    return pl.pallas_call(
        functools.partial(_ecosface_kernel, s=s),
        out_shape=jax.ShapeDtypeStruct((B, C), jnp.float32),
        grid_spec=pltpu.PrefetchScalarGridSpec(
            num_scalar_prefetch=0,
            # Class axis leading: W streamed once, and v7x megacore splits W
            # (not the tiny xn) across the 2 TensorCores.
            grid=(C // tc, B // tb),
            in_specs=[
                pl.BlockSpec((tb, E), lambda j, i: (i, 0)),   # xn batch tile
                pl.BlockSpec((tc, E), lambda j, i: (j, 0)),   # weight class tile
                pl.BlockSpec((tb, 1), lambda j, i: (i, 0)),   # labels  (tiny)
                pl.BlockSpec((tb, 1), lambda j, i: (i, 0)),   # margins (tiny)
            ],
            out_specs=pl.BlockSpec((tb, tc), lambda j, i: (i, j)),
        ),
        compiler_params=pltpu.CompilerParams(
            dimension_semantics=("parallel", "parallel"),
            vmem_limit_bytes=_VMEM_LIMIT_BYTES),
    )(
        xn,
        weight,
        labels.reshape(B, 1).astype(jnp.int32),
        margin.reshape(B, 1).astype(jnp.float32),
    )


# ---------------------------------------------------------------------------
# "plus" sorted-margin assignment (tiny O(B*E) pre-pass, plain JAX, f32)
# ---------------------------------------------------------------------------
def _assign_margins(xn, weight, labels, margin_raw, plus):
    if not plus:
        return margin_raw
    w_lab = weight[labels].astype(jnp.float32)                          # (B, E)
    w_lab = w_lab * jax.lax.rsqrt(
        jnp.maximum(jnp.sum(w_lab * w_lab, axis=-1, keepdims=True),
                    jnp.float32(1e-24)))
    distmat = jnp.sum(xn * w_lab, axis=-1)                              # (B,)
    indicate = jnp.argsort(-distmat)                                    # descending
    return jnp.sort(margin_raw, axis=0)[indicate]                       # (B, 1)


# ---------------------------------------------------------------------------
# Full ECosFace forward
# ---------------------------------------------------------------------------
def ecosface_forward(x, labels, weight, margin_raw, *, s=64.0, plus=True,
                     tb=None, tc=None):
    B, E = x.shape
    # TODO(synk): assumes all labels != -1 (the reference PyTorch fancy-indexing
    # only behaves when index covers the whole batch).
    xn = x.astype(jnp.float32)
    xn = xn * jax.lax.rsqrt(
        jnp.maximum(jnp.sum(xn * xn, axis=-1, keepdims=True), jnp.float32(1e-24)))

    margin_assigned = _assign_margins(xn, weight, labels, margin_raw, plus)
    return ecosface_fused(xn, weight, labels, margin_assigned, s=s, tb=tb, tc=tc)


# ---------------------------------------------------------------------------
# References for the correctness check
# ---------------------------------------------------------------------------
def ecosface_ref_f32(x, labels, weight, margin_raw, *, s=64.0, plus=True):
    """Pure-f32 mirror of the PyTorch forward."""
    wn = weight / jnp.maximum(jnp.linalg.norm(weight, axis=1, keepdims=True), 1e-12)
    xn = x / jnp.maximum(jnp.linalg.norm(x, axis=1, keepdims=True), 1e-12)
    logits = xn @ wn.T
    B, C = logits.shape
    idx = jnp.arange(B)
    if plus:
        distmat = logits[idx, labels]
        indicate = jnp.argsort(-distmat)
        margin_assigned = jnp.sort(margin_raw, axis=0)[indicate]
    else:
        margin_assigned = margin_raw
    m_hot = jnp.zeros((B, C), jnp.float32).at[idx, labels].set(margin_assigned[:, 0])
    return (logits - m_hot) * s


def ecosface_ref_bf16(x, labels, weight, margin_raw, *, s=64.0, plus=True):
    """Reference matching the kernel's bf16-matmul / f32-accum numerics."""
    xn = x.astype(jnp.float32)
    xn = xn * jax.lax.rsqrt(
        jnp.maximum(jnp.sum(xn * xn, axis=-1, keepdims=True), jnp.float32(1e-24)))
    w = weight.astype(jnp.float32)
    wn = w * jax.lax.rsqrt(
        jnp.maximum(jnp.sum(w * w, axis=-1, keepdims=True), jnp.float32(1e-24)))
    cos = jax.lax.dot_general(
        xn.astype(jnp.bfloat16), wn.astype(jnp.bfloat16),
        dimension_numbers=(((1,), (1,)), ((), ())),
        preferred_element_type=jnp.float32)
    margin_assigned = _assign_margins(xn, weight, labels, margin_raw, plus)
    B, C = cos.shape
    idx = jnp.arange(B)
    m_hot = jnp.zeros((B, C), jnp.float32).at[idx, labels].set(margin_assigned[:, 0])
    return (cos - m_hot) * s


if __name__ == "__main__":
    key = jax.random.PRNGKey(0)
    kx, kw, kl, km = jax.random.split(key, 4)

    B, E, C = 8, 128, 512          # batch, emb_size, num_classes
    s, m, std = 64.0, 0.35, 0.025

    x = jax.random.normal(kx, (B, E), dtype=jnp.float32)
    # nn.Parameter(torch.randn(num_classes, emb_size) * 0.01), deterministic init
    weight = jax.random.normal(kw, (C, E), dtype=jnp.float32) * 0.01
    labels = jax.random.randint(kl, (B,), 0, C, dtype=jnp.int32)
    # torch.normal(mean=m, std=std, size=(B, 1)) — deterministic synthetic draw
    margin_raw = m + std * jax.random.normal(km, (B, 1), dtype=jnp.float32)

    out = ecosface_forward(x, labels, weight, margin_raw, s=s, plus=True)
    out = jax.block_until_ready(out)
    assert out.shape == (B, C)

    # Tight check against a reference with matched bf16-matmul numerics.
    ref_matched = ecosface_ref_bf16(x, labels, weight, margin_raw, s=s, plus=True)
    assert jnp.allclose(out, ref_matched, atol=2e-2, rtol=2e-2)

    # Loose check against the pure-f32 PyTorch-mirror reference
    # (bf16 MXU inputs bound the error by ~s * 2^-8 ≈ 0.25 absolute).
    ref_f32 = ecosface_ref_f32(x, labels, weight, margin_raw, s=s, plus=True)
    assert jnp.allclose(out, ref_f32, atol=0.5)

    print("KERNEL_OK")
</pallas_src>

<mosaic_0001>
module attributes {stable_mosaic.version = 11 : i64} {
  func.func @_ecosface_kernel(%arg0: i32, %arg1: i32, %arg2: memref<8x128xf32, #tpu.memory_space<vmem>>, %arg3: memref<512x128xf32, #tpu.memory_space<vmem>>, %arg4: memref<8x1xi32, #tpu.memory_space<vmem>>, %arg5: memref<8x1xf32, #tpu.memory_space<vmem>>, %arg6: memref<8x512xf32, #tpu.memory_space<vmem>>) attributes {dimension_semantics = [#tpu.dimension_semantics<parallel>, #tpu.dimension_semantics<parallel>], iteration_bounds = array<i64: 1, 1>, scalar_prefetch = 0 : i64, scratch_operands = 0 : i64, tpu.core_type = #tpu.core_type<tc>, window_params = [{transform_indices = @transform_0, window_bounds = array<i64: 8, 128>}, {transform_indices = @transform_1, window_bounds = array<i64: 512, 128>}, {transform_indices = @transform_2, window_bounds = array<i64: 8, 1>}, {transform_indices = @transform_3, window_bounds = array<i64: 8, 1>}, {transform_indices = @transform_4, window_bounds = array<i64: 8, 512>}]} {
    %c0 = arith.constant 0 : index
    %c0_0 = arith.constant 0 : index
    %0 = vector.load %arg2[%c0, %c0_0] : memref<8x128xf32, #tpu.memory_space<vmem>>, vector<8x128xf32>
    %c0_1 = arith.constant 0 : index
    %c0_2 = arith.constant 0 : index
    %1 = vector.load %arg3[%c0_1, %c0_2] : memref<512x128xf32, #tpu.memory_space<vmem>>, vector<512x128xf32>
    %2 = arith.mulf %1, %1 : vector<512x128xf32>
    %cst = arith.constant dense<0.000000e+00> : vector<512xf32>
    %3 = vector.multi_reduction <add>, %2, %cst [1] : vector<512x128xf32> to vector<512xf32>
    %4 = vector.shape_cast %3 : vector<512xf32> to vector<512x1xf32>
    %cst_3 = arith.constant 1.000000e-24 : f32
    %5 = vector.broadcast %cst_3 : f32 to vector<512x1xf32>
    %6 = arith.maximumf %4, %5 : vector<512x1xf32>
    %7 = math.rsqrt %6 : vector<512x1xf32>
    %8 = vector.broadcast %7 : vector<512x1xf32> to vector<512x128xf32>
    %9 = arith.mulf %1, %8 : vector<512x128xf32>
    %10 = arith.truncf %0 : vector<8x128xf32> to vector<8x128xbf16>
    %11 = arith.truncf %9 : vector<512x128xf32> to vector<512x128xbf16>
    %cst_4 = arith.constant dense<0.000000e+00> : vector<8x512xf32>
    %12 = tpu.matmul %10, %11, %cst_4 {dimension_numbers = #tpu.dot_dimension_numbers<[1], [1], [0], [0], [0, 0, 1, 0], [], []>} : vector<8x128xbf16>, vector<512x128xbf16>, vector<8x512xf32> -> vector<8x512xf32>
    %c0_5 = arith.constant 0 : index
    %c0_6 = arith.constant 0 : index
    %13 = vector.load %arg4[%c0_5, %c0_6] : memref<8x1xi32, #tpu.memory_space<vmem>>, vector<8x1xi32>
    %c512_i32 = arith.constant 512 : i32
    %14 = arith.muli %arg0, %c512_i32 : i32
    %15 = vector.broadcast %14 : i32 to vector<8x1xi32>
    %16 = arith.subi %13, %15 : vector<8x1xi32>
    %17 = tpu.iota {dimensions = array<i32: 1>} : vector<8x512xi32>
    %18 = vector.broadcast %16 : vector<8x1xi32> to vector<8x512xi32>
    %19 = arith.cmpi eq, %17, %18 : vector<8x512xi32>
    %c0_7 = arith.constant 0 : index
    %c0_8 = arith.constant 0 : index
    %20 = vector.load %arg5[%c0_7, %c0_8] : memref<8x1xf32, #tpu.memory_space<vmem>>, vector<8x1xf32>
    %cst_9 = arith.constant 0.000000e+00 : f32
    %21 = vector.shape_cast %20 : vector<8x1xf32> to vector<8x1xf32>
    %22 = vector.broadcast %21 : vector<8x1xf32> to vector<8x512xf32>
    %23 = vector.broadcast %cst_9 : f32 to vector<8x512xf32>
    %24 = arith.select %19, %22, %23 : vector<8x512xi1>, vector<8x512xf32>
    %25 = arith.subf %12, %24 : vector<8x512xf32>
    %cst_10 = arith.constant 6.400000e+01 : f32
    %26 = vector.broadcast %cst_10 : f32 to vector<8x512xf32>
    %27 = arith.mulf %25, %26 : vector<8x512xf32>
    %c0_11 = arith.constant 0 : index
    %c0_12 = arith.constant 0 : index
    %28 = vector.load %arg6[%c0_11, %c0_12] : memref<8x512xf32, #tpu.memory_space<vmem>>, vector<8x512xf32>
    tpu.vector_store %arg6[%c0_11, %c0_12], %27 {strides = array<i32>} : memref<8x512xf32, #tpu.memory_space<vmem>>, vector<8x512xf32>,
    return
  }
  func.func @transform_0(%arg0: i32, %arg1: i32) -> (i32, i32) {
    %c0_i32 = arith.constant 0 : i32
    %c0_i32_0 = arith.constant 0 : i32
    return %arg1, %c0_i32 : i32, i32
  }
  func.func @transform_1(%arg0: i32, %arg1: i32) -> (i32, i32) {
    %c0_i32 = arith.constant 0 : i32
    %c0_i32_0 = arith.constant 0 : i32
    return %arg0, %c0_i32 : i32, i32
  }
  func.func @transform_2(%arg0: i32, %arg1: i32) -> (i32, i32) {
    %c0_i32 = arith.constant 0 : i32
    %c0_i32_0 = arith.constant 0 : i32
    return %arg1, %c0_i32 : i32, i32
  }
  func.func @transform_3(%arg0: i32, %arg1: i32) -> (i32, i32) {
    %c0_i32 = arith.constant 0 : i32
    %c0_i32_0 = arith.constant 0 : i32
    return %arg1, %c0_i32 : i32, i32
  }
  func.func @transform_4(%arg0: i32, %arg1: i32) -> (i32, i32) {
    %c0_i32 = arith.constant 0 : i32
    return %arg1, %arg0 : i32, i32
  }
}

</mosaic_0001>

<bundles_post_ra>
// kernel: tpu_custom_call.1
= control target key start
LH: loop header
LB: loop body
LE: loop exit
PB: predicated region body
PF: predicated region fallthrough
CT: control target
= control target key end

     0   :  { %9 = vsyncpa [#allocation3], 0  ;;  %s1236_s0 = inlined_call_operand.vmem [shape: f32[8,128], index: 0, kind: input, shape index: {}]   ;;  %s1237_s1 = inlined_call_operand.hbm [shape: f32[512,128], index: 1, kind: input, shape index: {}]   ;;  %s1238_s2 = inlined_call_operand.vmem [shape: s32[8,1], index: 2, kind: input, shape index: {}]   ;;  %s1239_s3 = inlined_call_operand.vmem [shape: f32[8,1], index: 3, kind: input, shape index: {}]   ;;  %s1240_s4 = inlined_call_operand.hbm [shape: f32[8,512], index: 4, kind: output, shape index: {}]  }
   0x1   :  { %10 = vsyncpa [#allocation4], 0  ;;  %s865_s15 = smov [#allocation2]  }
   0x2   :  { %s18_s16 = sshll.u32 %s865_s15, 4  ;;  %s19_s16 = int_to_ptr.vmem [resolvable:$true] %s18_s16 }
   0x3   :  { %s829_s17 = scalar_lea.vmem %s19_s16, 8192  ;;  %p834_p1 = scmp.lt.s32.totalorder %s19_s16, %s19_s16 }
   0x4   :  { %p830_p0 = scmp.ne.s32.totalorder %s19_s16, %s829_s17  ;;  %p835_p2 = scmp.lt.s32.totalorder %s829_s17, %s829_s17 }
   0x6   :  { %p836_p3 = por %p835_p2, %p834_p1 }
   0x8   :  { %p837_p4 = pnand %p836_p3, %p830_p0 }
   0xa   :  { %840 = shalt.err (!%p837_p4)
}
   0xb   :  { %s866_s18 = smov 128   ;;  %s867_s19 = smov 8  }
   0xc   :  { %24 = dma.hbm_to_vmem [thread:$0]  %s1237_s1, 8192, %s19_s16, [#allocation3], %s866_s18, %s866_s18, %s867_s19  }
   0xd   :  { %861 = dma.done.wait [#allocation3], 8192  }
   0xe   :  { %862 = vsyncadd [#allocation3], 4294959104  ;;  %v898_v0 = vld [vmem:[#allocation2 + $0x1f0] sm:$0xff]  ;;  %v902_v2 = vld [vmem:[#allocation2 + $0x1f8] sm:$0xff] }
   0xf   :  { %v900_v1 = vld [vmem:[#allocation2 + $0xf0] sm:$0xff]  ;;  %v160_v3 = vmul.f32 %v898_v0, %v898_v0  ;;  %v908_v5 = vld [vmem:[#allocation2 + $0xf8] sm:$0xff]  ;;  %v161_v6 = vmul.f32 %v902_v2, %v902_v2  ;;  %v930_v16 = vld [vmem:[#allocation2 + $0xe8] sm:$0xff] }
  0x10   :  { %v128_v4 = vmul.f32 %v900_v1, %v900_v1  ;;  %v129_v7 = vmul.f32 %v908_v5, %v908_v5  ;;  %v914_v8 = vld [vmem:[#allocation2 + $0x78] sm:$0xff]  ;;  %v916_v9 = vld [vmem:[#allocation2 + $0x70] sm:$0xff]  ;;  %v932_v17 = vld [vmem:[#allocation2 + $0xe0] sm:$0xff]  ;;  %v127_v18 = vmul.f32 %v930_v16, %v930_v16 }
  0x11   :  { %286 = vadd.xlane.f32.xlu1 %v160_v3  ;;  %v113_v10 = vmul.f32 %v914_v8, %v914_v8  ;;  %v112_v11 = vmul.f32 %v916_v9, %v916_v9  ;;  %v922_v12 = vld [vmem:[#allocation2 + $0x178] sm:$0xff]  ;;  %v924_v13 = vld [vmem:[#allocation2 + $0x170] sm:$0xff]  ;;  %v126_v19 = vmul.f32 %v932_v17, %v932_v17  ;;  %v938_v20 = vld [vmem:[#allocation2 + $0x1e8] sm:$0xff] }
  0x12   :  { %222 = vadd.xlane.f32.xlu0 %v128_v4  ;;  %v145_v14 = vmul.f32 %v922_v12, %v922_v12  ;;  %v144_v15 = vmul.f32 %v924_v13, %v924_v13  ;;  %v940_v21 = vld [vmem:[#allocation2 + $0x1e0] sm:$0xff]  ;;  %v159_v22 = vmul.f32 %v938_v20, %v938_v20  ;;  %v946_v24 = vld [vmem:[#allocation2 + $0x68] sm:$0xff]  ;;  %v962_v32 = vld [vmem:[#allocation2 + $0xd8] sm:$0xff] }
  0x13   :  { %v158_v23 = vmul.f32 %v940_v21, %v940_v21  ;;  %v948_v25 = vld [vmem:[#allocation2 + $0x60] sm:$0xff]  ;;  %v111_v26 = vmul.f32 %v946_v24, %v946_v24  ;;  %v954_v28 = vld [vmem:[#allocation2 + $0x168] sm:$0xff]  ;;  %v964_v33 = vld [vmem:[#allocation2 + $0xd0] sm:$0xff]  ;;  %v125_v34 = vmul.f32 %v962_v32, %v962_v32 }
  0x14   :  { %v110_v27 = vmul.f32 %v948_v25, %v948_v25  ;;  %v956_v29 = vld [vmem:[#allocation2 + $0x160] sm:$0xff]  ;;  %v143_v30 = vmul.f32 %v954_v28, %v954_v28  ;;  %v124_v35 = vmul.f32 %v964_v33, %v964_v33  ;;  %v970_v36 = vld [vmem:[#allocation2 + $0x1d8] sm:$0xff]  ;;  %v972_v37 = vld [vmem:[#allocation2 + $0x1d0] sm:$0xff] }
  0x15   :  { %288 = vadd.xlane.f32.xlu1 %v161_v6  ;;  %v142_v31 = vmul.f32 %v956_v29, %v956_v29  ;;  %v157_v38 = vmul.f32 %v970_v36, %v970_v36  ;;  %v156_v39 = vmul.f32 %v972_v37, %v972_v37  ;;  %v978_v40 = vld [vmem:[#allocation2 + $0x58] sm:$0xff]  ;;  %v980_v41 = vld [vmem:[#allocation2 + $0x50] sm:$0xff]  ;;  %v994_v48 = vld [vmem:[#allocation2 + $0xc8] sm:$0xff] }
  0x16   :  { %224 = vadd.xlane.f32.xlu0 %v129_v7  ;;  %v109_v42 = vmul.f32 %v978_v40, %v978_v40  ;;  %v108_v43 = vmul.f32 %v980_v41, %v980_v41  ;;  %v986_v44 = vld [vmem:[#allocation2 + $0x158] sm:$0xff]  ;;  %v988_v45 = vld [vmem:[#allocation2 + $0x150] sm:$0xff]  ;;  %v996_v49 = vld [vmem:[#allocation2 + $0xc0] sm:$0xff]  ;;  %v123_v50 = vmul.f32 %v994_v48, %v994_v48 }
  0x17   :  { %v141_v46 = vmul.f32 %v986_v44, %v986_v44  ;;  %v140_v47 = vmul.f32 %v988_v45, %v988_v45  ;;  %v122_v51 = vmul.f32 %v996_v49, %v996_v49  ;;  %v1002_v52 = vld [vmem:[#allocation2 + $0x1c8] sm:$0xff]  ;;  %v1004_v53 = vld [vmem:[#allocation2 + $0x1c0] sm:$0xff]  ;;  %v1026_v3 = vld [vmem:[#allocation2 + $0xb8] sm:$0xff] }
  0x18   :  { %v155_v54 = vmul.f32 %v1002_v52, %v1002_v52  ;;  %v154_v55 = vmul.f32 %v1004_v53, %v1004_v53  ;;  %v1010_v56 = vld [vmem:[#allocation2 + $0x48] sm:$0xff]  ;;  %v1012_v57 = vld [vmem:[#allocation2 + $0x40] sm:$0xff]  ;;  %v1028_v4 = vld [vmem:[#allocation2 + $0xb0] sm:$0xff]  ;;  %v121_v6 = vmul.f32 %v1026_v3, %v1026_v3 }
  0x19   :  { %192 = vadd.xlane.f32.xlu1 %v113_v10  ;;  %v107_v58 = vmul.f32 %v1010_v56, %v1010_v56  ;;  %v106_v59 = vmul.f32 %v1012_v57, %v1012_v57  ;;  %v1018_v60 = vld [vmem:[#allocation2 + $0x148] sm:$0xff]  ;;  %v1020_v61 = vld [vmem:[#allocation2 + $0x140] sm:$0xff]  ;;  %v120_v7 = vmul.f32 %v1028_v4, %v1028_v4  ;;  %v1034_v10 = vld [vmem:[#allocation2 + $0x1b8] sm:$0xff] }
  0x1a   :  { %190 = vadd.xlane.f32.xlu0 %v112_v11  ;;  %v139_v62 = vmul.f32 %v1018_v60, %v1018_v60  ;;  %v138_v63 = vmul.f32 %v1020_v61, %v1020_v61  ;;  %v1036_v11 = vld [vmem:[#allocation2 + $0x1b0] sm:$0xff] }
  0x1d   :  { %256 = vadd.xlane.f32.xlu1 %v145_v14  ;;  %v153_v14 = vmul.f32 %v1034_v10, %v1034_v10 }
  0x1e   :  { %254 = vadd.xlane.f32.xlu0 %v144_v15  ;;  %v152_v15 = vmul.f32 %v1036_v11, %v1036_v11 }
  0x21   :  { %220 = vadd.xlane.f32.xlu1 %v127_v18  ;;  %v1042_v18 = vld [vmem:[#allocation2 + $0x38] sm:$0xff] }
  0x22   :  { %218 = vadd.xlane.f32.xlu0 %v126_v19  ;;  %v1044_v19 = vld [vmem:[#allocation2 + $0x30] sm:$0xff] }
  0x25   :  { %284 = vadd.xlane.f32.xlu1 %v159_v22  ;;  %v105_v22 = vmul.f32 %v1042_v18, %v1042_v18 }
  0x26   :  { %282 = vadd.xlane.f32.xlu0 %v158_v23  ;;  %v104_v23 = vmul.f32 %v1044_v19, %v1044_v19 }
  0x29   :  { %188 = vadd.xlane.f32.xlu1 %v111_v26  ;;  %v1050_v26 = vld [vmem:[#allocation2 + $0x138] sm:$0xff] }
  0x2a   :  { %186 = vadd.xlane.f32.xlu0 %v110_v27  ;;  %v1052_v27 = vld [vmem:[#allocation2 + $0x130] sm:$0xff] }
  0x2d   :  { %252 = vadd.xlane.f32.xlu1 %v143_v30  ;;  %v137_v30 = vmul.f32 %v1050_v26, %v1050_v26 }
  0x2e   :  { %250 = vadd.xlane.f32.xlu0 %v142_v31  ;;  %v136_v31 = vmul.f32 %v1052_v27, %v1052_v27 }
  0x31   :  { %216 = vadd.xlane.f32.xlu1 %v125_v34  ;;  %v1058_v34 = vld [vmem:[#allocation2 + $0xa8] sm:$0xff] }
  0x32   :  { %214 = vadd.xlane.f32.xlu0 %v124_v35  ;;  %v1060_v35 = vld [vmem:[#allocation2 + $0xa0] sm:$0xff] }
  0x35   :  { %280 = vadd.xlane.f32.xlu1 %v157_v38  ;;  %v119_v38 = vmul.f32 %v1058_v34, %v1058_v34 }
  0x36   :  { %278 = vadd.xlane.f32.xlu0 %v156_v39  ;;  %v118_v39 = vmul.f32 %v1060_v35, %v1060_v35 }
  0x39   :  { %184 = vadd.xlane.f32.xlu1 %v109_v42  ;;  %v1066_v42 = vld [vmem:[#allocation2 + $0x1a8] sm:$0xff] }
  0x3a   :  { %182 = vadd.xlane.f32.xlu0 %v108_v43  ;;  %v1068_v43 = vld [vmem:[#allocation2 + $0x1a0] sm:$0xff] }
  0x3d   :  { %248 = vadd.xlane.f32.xlu1 %v141_v46  ;;  %v151_v46 = vmul.f32 %v1066_v42, %v1066_v42 }
  0x3e   :  { %246 = vadd.xlane.f32.xlu0 %v140_v47  ;;  %v150_v47 = vmul.f32 %v1068_v43, %v1068_v43 }
  0x41   :  { %212 = vadd.xlane.f32.xlu1 %v123_v50  ;;  %v1074_v50 = vld [vmem:[#allocation2 + $0x28] sm:$0xff] }
  0x42   :  { %210 = vadd.xlane.f32.xlu0 %v122_v51  ;;  %1263 = vst [vmem:[#allocation8_spill] sm:$0xff] %v1074_v50  ;;  %v1076_v51 = vld [vmem:[#allocation2 + $0x20] sm:$0xff] }
  0x43   :  { %1264 = vst [vmem:[#allocation9_spill] sm:$0xff] %v1076_v51 }
  0x45   :  { %276 = vadd.xlane.f32.xlu1 %v155_v54  ;;  %v103_v54 = vmul.f32 %v1074_v50, %v1074_v50 }
  0x46   :  { %274 = vadd.xlane.f32.xlu0 %v154_v55  ;;  %v102_v55 = vmul.f32 %v1076_v51, %v1076_v51 }
  0x49   :  { %180 = vadd.xlane.f32.xlu1 %v107_v58  ;;  %v1082_v58 = vld [vmem:[#allocation2 + $0x128] sm:$0xff] }
  0x4a   :  { %178 = vadd.xlane.f32.xlu0 %v106_v59  ;;  %1265 = vst [vmem:[#allocation10_spill] sm:$0xff] %v1082_v58  ;;  %v1084_v59 = vld [vmem:[#allocation2 + $0x120] sm:$0xff] }
  0x4b   :  { %1266 = vst [vmem:[#allocation11_spill] sm:$0xff] %v1084_v59 }
  0x4d   :  { %244 = vadd.xlane.f32.xlu1 %v139_v62  ;;  %v135_v62 = vmul.f32 %v1082_v58, %v1082_v58 }
  0x4e   :  { %242 = vadd.xlane.f32.xlu0 %v138_v63  ;;  %v134_v63 = vmul.f32 %v1084_v59, %v1084_v59 }
  0x51   :  { %208 = vadd.xlane.f32.xlu1 %v121_v6  ;;  %v1090_v6 = vld [vmem:[#allocation2 + $0x98] sm:$0xff] }
  0x52   :  { %206 = vadd.xlane.f32.xlu0 %v120_v7  ;;  %1267 = vst [vmem:[#allocation12_spill] sm:$0xff] %v1090_v6  ;;  %v1092_v7 = vld [vmem:[#allocation2 + $0x90] sm:$0xff] }
  0x53   :  { %1268 = vst [vmem:[#allocation13_spill] sm:$0xff] %v1092_v7 }
  0x55   :  { %272 = vadd.xlane.f32.xlu1 %v153_v14  ;;  %v117_v14 = vmul.f32 %v1090_v6, %v1090_v6 }
  0x56   :  { %270 = vadd.xlane.f32.xlu0 %v152_v15  ;;  %v116_v15 = vmul.f32 %v1092_v7, %v1092_v7 }
  0x59   :  { %176 = vadd.xlane.f32.xlu1 %v105_v22  ;;  %v1098_v22 = vld [vmem:[#allocation2 + $0x198] sm:$0xff] }
  0x5a   :  { %174 = vadd.xlane.f32.xlu0 %v104_v23  ;;  %1269 = vst [vmem:[#allocation14_spill] sm:$0xff] %v1098_v22  ;;  %v1100_v23 = vld [vmem:[#allocation2 + $0x190] sm:$0xff] }
  0x5b   :  { %1270 = vst [vmem:[#allocation15_spill] sm:$0xff] %v1100_v23 }
  0x5d   :  { %240 = vadd.xlane.f32.xlu1 %v137_v30  ;;  %v149_v30 = vmul.f32 %v1098_v22, %v1098_v22 }
  0x5e   :  { %238 = vadd.xlane.f32.xlu0 %v136_v31  ;;  %v148_v31 = vmul.f32 %v1100_v23, %v1100_v23 }
  0x61   :  { %204 = vadd.xlane.f32.xlu1 %v119_v38  ;;  %v1106_v38 = vld [vmem:[#allocation2 + $0x18] sm:$0xff] }
  0x62   :  { %202 = vadd.xlane.f32.xlu0 %v118_v39  ;;  %1271 = vst [vmem:[#allocation16_spill] sm:$0xff] %v1106_v38  ;;  %v1108_v39 = vld [vmem:[#allocation2 + $0x10] sm:$0xff] }
  0x63   :  { %1272 = vst [vmem:[#allocation17_spill] sm:$0xff] %v1108_v39 }
  0x65   :  { %268 = vadd.xlane.f32.xlu1 %v151_v46  ;;  %v101_v46 = vmul.f32 %v1106_v38, %v1106_v38 }
  0x66   :  { %266 = vadd.xlane.f32.xlu0 %v150_v47  ;;  %v100_v47 = vmul.f32 %v1108_v39, %v1108_v39 }
  0x69   :  { %172 = vadd.xlane.f32.xlu1 %v103_v54  ;;  %v1114_v54 = vld [vmem:[#allocation2 + $0x118] sm:$0xff] }
  0x6a   :  { %170 = vadd.xlane.f32.xlu0 %v102_v55  ;;  %1273 = vst [vmem:[#allocation18_spill] sm:$0xff] %v1114_v54  ;;  %v1116_v55 = vld [vmem:[#allocation2 + $0x110] sm:$0xff] }
  0x6b   :  { %1274 = vst [vmem:[#allocation19_spill] sm:$0xff] %v1116_v55 }
  0x6d   :  { %236 = vadd.xlane.f32.xlu1 %v135_v62  ;;  %v133_v62 = vmul.f32 %v1114_v54, %v1114_v54 }
  0x6e   :  { %234 = vadd.xlane.f32.xlu0 %v134_v63  ;;  %v132_v63 = vmul.f32 %v1116_v55, %v1116_v55 }
  0x71   :  { %200 = vadd.xlane.f32.xlu1 %v117_v14  ;;  %v1122_v14 = vld [vmem:[#allocation2 + $0x88] sm:$0xff] }
  0x72   :  { %198 = vadd.xlane.f32.xlu0 %v116_v15  ;;  %1275 = vst [vmem:[#allocation20_spill] sm:$0xff] %v1122_v14  ;;  %v1124_v15 = vld [vmem:[#allocation2 + $0x80] sm:$0xff] }
  0x73   :  { %1276 = vst [vmem:[#allocation21_spill] sm:$0xff] %v1124_v15 }
  0x75   :  { %264 = vadd.xlane.f32.xlu1 %v149_v30  ;;  %v115_v30 = vmul.f32 %v1122_v14, %v1122_v14 }
  0x76   :  { %262 = vadd.xlane.f32.xlu0 %v148_v31  ;;  %v114_v31 = vmul.f32 %v1124_v15, %v1124_v15 }
  0x79   :  { %168 = vadd.xlane.f32.xlu1 %v101_v46  ;;  %v1130_v46 = vld [vmem:[#allocation2 + $0x188] sm:$0xff] }
  0x7a   :  { %166 = vadd.xlane.f32.xlu0 %v100_v47  ;;  %1277 = vst [vmem:[#allocation22_spill] sm:$0xff] %v1130_v46  ;;  %v1132_v47 = vld [vmem:[#allocation2 + $0x180] sm:$0xff]  ;;  %v147_v55 = vmul.f32 %v1130_v46, %v1130_v46 }
  0x7b   :  { %1278 = vst [vmem:[#allocation23_spill] sm:$0xff] %v1132_v47  ;;  %v146_v54 = vmul.f32 %v1132_v47, %v1132_v47 }
  0x7d   :  { %232 = vadd.xlane.f32.xlu1 %v133_v62  ;;  %v1138_v62 = vld [vmem:[#allocation2 + $0x8] sm:$0xff] }
  0x7e   :  { %230 = vadd.xlane.f32.xlu0 %v132_v63  ;;  %1279 = vst [vmem:[#allocation24_spill] sm:$0xff] %v1138_v62  ;;  %v1140_v63 = vld [vmem:[#allocation2] sm:$0xff]  ;;  %v99_v15 = vmul.f32 %v1138_v62, %v1138_v62 }
  0x7f   :  { %1280 = vst [vmem:[#allocation25_spill] sm:$0xff] %v1140_v63  ;;  %v98_v14 = vmul.f32 %v1140_v63, %v1140_v63 }
  0x81   :  { %196 = vadd.xlane.f32.xlu1 %v115_v30  ;;  %v1146_v30 = vld [vmem:[#allocation2 + $0x108] sm:$0xff] }
  0x82   :  { %194 = vadd.xlane.f32.xlu0 %v114_v31  ;;  %1281 = vst [vmem:[#allocation26_spill] sm:$0xff] %v1146_v30  ;;  %v1148_v31 = vld [vmem:[#allocation2 + $0x100] sm:$0xff]  ;;  %v131_v47 = vmul.f32 %v1146_v30, %v1146_v30 }
  0x83   :  { %1282 = vst [vmem:[#allocation27_spill] sm:$0xff] %v1148_v31  ;;  %v130_v46 = vmul.f32 %v1148_v31, %v1148_v31 }
  0x85   :  { %260 = vadd.xlane.f32.xlu1 %v147_v55 }
  0x86   :  { %258 = vadd.xlane.f32.xlu0 %v146_v54 }
  0x89   :  { %164 = vadd.xlane.f32.xlu1 %v99_v15 }
  0x8a   :  { %162 = vadd.xlane.f32.xlu0 %v98_v14 }
  0x8d   :  { %228 = vadd.xlane.f32.xlu1 %v131_v47 }
  0x8e   :  { %226 = vadd.xlane.f32.xlu0 %v130_v46 }
  0x9a   :  { %v287_v54 = vpop.xlane.xlu1 %286 }
  0x9b   :  { %v223_v55 = vpop.xlane.xlu0 %222  ;;  %v352_v62 = vmax.f32 %v287_v54, 1e-24 }
  0x9c   :  { %v320_v39 = vmax.f32 %v223_v55, 1e-24 }
  0x9d   :  { %693 = vrsqrt.f32 %v352_v62 }
  0x9e   :  { %v289_v38 = vpop.xlane.xlu1 %288  ;;  %695 = vrsqrt.f32 %v320_v39 }
  0x9f   :  { %v225_v63 = vpop.xlane.xlu0 %224  ;;  %v353_v23 = vmax.f32 %v289_v38, 1e-24 }
  0xa0   :  { %v321_v22 = vmax.f32 %v225_v63, 1e-24 }
  0xa1   :  { %697 = vrsqrt.f32 %v353_v23 }
  0xa2   :  { %699 = vrsqrt.f32 %v321_v22  ;;  %v193_v14 = vpop.xlane.xlu1 %192  ;;  %v33_v22 = vld [vmem:[%s1236_s0] sm:$0xff] }
  0xa3   :  { %v191_v15 = vpop.xlane.xlu0 %190  ;;  %v305_v30 = vmax.f32 %v193_v14, 1e-24  ;;  %v1157_v39 = vpack.c.bf16 %v33_v22, %v33_v22 }
  0xa4   :  { %v304_v7 = vmax.f32 %v191_v15, 1e-24 }
  0xa5   :  { %701 = vrsqrt.f32 %v305_v30  ;;  %1283 = vst [vmem:[#allocation28_spill] sm:$0xff] %v1157_v39  ;;  %666 = vmatprep.mubr.bf16.mxu0 %v1157_v39  ;;  %684 = vmatprep.mubr.bf16.mxu1 %v1157_v39 }
  0xa6   :  { %703 = vrsqrt.f32 %v304_v7  ;;  %v257_v47 = vpop.xlane.xlu1 %256 }
  0xa7   :  { %v255_v46 = vpop.xlane.xlu0 %254  ;;  %v337_v31 = vmax.f32 %v257_v47, 1e-24 }
  0xa8   :  { %v336_v6 = vmax.f32 %v255_v46, 1e-24 }
  0xa9   :  { %705 = vrsqrt.f32 %v337_v31 }
  0xaa   :  { %707 = vrsqrt.f32 %v336_v6  ;;  %v221_v54 = vpop.xlane.xlu1 %220  ;;  %v694_v23 = vpop.eup %693 }
  0xab   :  { %v219_v55 = vpop.xlane.xlu0 %218  ;;  %v319_v62 = vmax.f32 %v221_v54, 1e-24  ;;  %v696_v63 = vpop.eup %695  ;;  %v480_v47 = vmul.f32 %v694_v23, %v898_v0  ;;  %v597_v0 = vld [vmem:[%s1238_s2] sm:$0xff]  ;;  %s869_s2 = smov [#allocation5]  }
  0xac   :  { %v318_v38 = vmax.f32 %v219_v55, 1e-24  ;;  %v448_v54 = vmul.f32 %v696_v63, %v900_v1 }
  0xad   :  { %709 = vrsqrt.f32 %v319_v62 }
  0xae   :  { %v698_v7 = vpop.eup %697  ;;  %711 = vrsqrt.f32 %v318_v38  ;;  %v285_v30 = vpop.xlane.xlu1 %284 }
  0xaf   :  { %v283_v14 = vpop.xlane.xlu0 %282  ;;  %v700_v6 = vpop.eup %699  ;;  %v351_v31 = vmax.f32 %v285_v30, 1e-24  ;;  %v481_v46 = vmul.f32 %v698_v7, %v902_v2  ;;  %v868_v2 = vmov 0  }
  0xb0   :  { %v350_v15 = vmax.f32 %v283_v14, 1e-24  ;;  %v449_v55 = vmul.f32 %v700_v6, %v908_v5  ;;  %691 = vset.pattern.permute.xlu0 %v868_v2  ;;  %v613_v5 = vld [vmem:[%s1239_s3] sm:$0xff]  ;;  %692 = vset.pattern.permute.xlu1 %v868_v2  ;;  %s641_s3 = sshll.u32 %s869_s2, 4  ;;  %s642_s3 = int_to_ptr.vmem [resolvable:$true] %s641_s3 }
  0xb1   :  { %713 = vrsqrt.f32 %v351_v31  ;;  %v514_v62 = vpack.c.bf16 %v481_v46, %v480_v47  ;;  %607 = vperm.xlu0 %691, %v597_v0   ;;  %616 = vperm.xlu1 %692, %v613_v5   ;;  %s841_s26 = scalar_lea.vmem %s642_s3, 512  ;;  %p846_p6 = scmp.lt.s32.totalorder %s642_s3, %s642_s3 }
  0xb2   :  { %v702_v38 = vpop.eup %701  ;;  %715 = vrsqrt.f32 %v350_v15  ;;  %v189_v22 = vpop.xlane.xlu1 %188  ;;  %v498_v58 = vpack.c.bf16 %v449_v55, %v448_v54  ;;  %p842_p5 = scmp.ne.s32.totalorder %s642_s3, %s841_s26  ;;  %p847_p7 = scmp.lt.s32.totalorder %s841_s26, %s841_s26 }
  0xb3   :  { %v187_v59 = vpop.xlane.xlu0 %186  ;;  %v704_v51 = vpop.eup %703  ;;  %v303_v39 = vmax.f32 %v189_v22, 1e-24  ;;  %668 = vmatprep.subr.bf16.mxu1 %v514_v62  ;;  %v433_v30 = vmul.f32 %v702_v38, %v914_v8 }
  0xb4   :  { %v302_v50 = vmax.f32 %v187_v59, 1e-24  ;;  %650 = vmatprep.subr.bf16.mxu0 %v498_v58  ;;  %v432_v1 = vmul.f32 %v704_v51, %v916_v9  ;;  %p848_p8 = por %p847_p7, %p846_p6 }
  0xb5   :  { %717 = vrsqrt.f32 %v303_v39 }
  0xb6   :  { %v706_v59 = vpop.eup %705  ;;  %719 = vrsqrt.f32 %v302_v50  ;;  %v253_v23 = vpop.xlane.xlu1 %252  ;;  %v490_v63 = vpack.c.bf16 %v433_v30, %v432_v1  ;;  %p849_p9 = pnand %p848_p8, %p842_p5 }
  0xb7   :  { %v251_v8 = vpop.xlane.xlu0 %250  ;;  %v708_v7 = vpop.eup %707  ;;  %v335_v14 = vmax.f32 %v253_v23, 1e-24  ;;  %v465_v9 = vmul.f32 %v706_v59, %v922_v12 }
  0xb8   :  { %v334_v58 = vmax.f32 %v251_v8, 1e-24  ;;  %651 = vmatpush3.bf16.xpose.msra.mxu0 %v490_v63  ;;  %v464_v51 = vmul.f32 %v708_v7, %v924_v13 }
  0xb9   :  { %721 = vrsqrt.f32 %v335_v14 }
  0xba   :  { %v710_v6 = vpop.eup %709  ;;  %723 = vrsqrt.f32 %v334_v58  ;;  %v217_v39 = vpop.xlane.xlu1 %216  ;;  %v506_v15 = vpack.c.bf16 %v465_v9, %v464_v51 }
  0xbb   :  { %v215_v31 = vpop.xlane.xlu0 %214  ;;  %v712_v47 = vpop.eup %711  ;;  %v317_v50 = vmax.f32 %v217_v39, 1e-24  ;;  %v447_v54 = vmul.f32 %v710_v6, %v930_v16 }
  0xbc   :  { %v316_v46 = vmax.f32 %v215_v31, 1e-24  ;;  %669 = vmatpush3.bf16.xpose.msra.mxu1 %v506_v15  ;;  %v446_v55 = vmul.f32 %v712_v47, %v932_v17 }
  0xbd   :  { %725 = vrsqrt.f32 %v317_v50 }
  0xbe   :  { %v714_v62 = vpop.eup %713  ;;  %727 = vrsqrt.f32 %v316_v46  ;;  %v281_v12 = vpop.xlane.xlu1 %280  ;;  %v497_v13 = vpack.c.bf16 %v447_v54, %v446_v55 }
  0xbf   :  { %v279_v38 = vpop.xlane.xlu0 %278  ;;  %v716_v22 = vpop.eup %715  ;;  %v349_v30 = vmax.f32 %v281_v12, 1e-24  ;;  %v479_v1 = vmul.f32 %v714_v62, %v938_v20 }
  0xc0   :  { %v348_v0 = vmax.f32 %v279_v38, 1e-24  ;;  %652 = vmatprep.subr.bf16.mxu0 %v497_v13  ;;  %v478_v2 = vmul.f32 %v716_v22, %v940_v21 }
  0xc1   :  { %729 = vrsqrt.f32 %v349_v30 }
  0xc2   :  { %v718_v5 = vpop.eup %717  ;;  %731 = vrsqrt.f32 %v348_v0  ;;  %v185_v16 = vpop.xlane.xlu1 %184  ;;  %v513_v17 = vpack.c.bf16 %v479_v1, %v478_v2 }
  0xc3   :  { %v183_v59 = vpop.xlane.xlu0 %182  ;;  %v720_v23 = vpop.eup %719  ;;  %v301_v8 = vmax.f32 %v185_v16, 1e-24  ;;  %v431_v7 = vmul.f32 %v718_v5, %v946_v24 }
  0xc4   :  { %v300_v63 = vmax.f32 %v183_v59, 1e-24  ;;  %670 = vmatprep.subr.bf16.mxu1 %v513_v17  ;;  %v430_v14 = vmul.f32 %v720_v23, %v948_v25 }
  0xc5   :  { %733 = vrsqrt.f32 %v301_v8 }
  0xc6   :  { %v722_v58 = vpop.eup %721  ;;  %735 = vrsqrt.f32 %v300_v63  ;;  %v249_v20 = vpop.xlane.xlu1 %248  ;;  %v489_v21 = vpack.c.bf16 %v431_v7, %v430_v14 }
  0xc7   :  { %v247_v9 = vpop.xlane.xlu0 %246  ;;  %v724_v51 = vpop.eup %723  ;;  %v333_v6 = vmax.f32 %v249_v20, 1e-24  ;;  %v463_v31 = vmul.f32 %v722_v58, %v954_v28 }
  0xc8   :  { %v332_v39 = vmax.f32 %v247_v9, 1e-24  ;;  %653 = vmatpush3.bf16.xpose.msra.mxu0 %v489_v21  ;;  %v462_v15 = vmul.f32 %v724_v51, %v956_v29 }
  0xc9   :  { %737 = vrsqrt.f32 %v333_v6 }
  0xca   :  { %v726_v47 = vpop.eup %725  ;;  %739 = vrsqrt.f32 %v332_v39  ;;  %v213_v24 = vpop.xlane.xlu1 %212  ;;  %v505_v25 = vpack.c.bf16 %v463_v31, %v462_v15 }
  0xcb   :  { %v211_v50 = vpop.xlane.xlu0 %210  ;;  %v728_v46 = vpop.eup %727  ;;  %v315_v54 = vmax.f32 %v213_v24, 1e-24  ;;  %v445_v62 = vmul.f32 %v726_v47, %v962_v32 }
  0xcc   :  { %v314_v55 = vmax.f32 %v211_v50, 1e-24  ;;  %671 = vmatpush3.bf16.xpose.msra.mxu1 %v505_v25  ;;  %v444_v12 = vmul.f32 %v728_v46, %v964_v33 }
  0xcd   :  { %741 = vrsqrt.f32 %v315_v54 }
  0xce   :  { %v730_v38 = vpop.eup %729  ;;  %743 = vrsqrt.f32 %v314_v55  ;;  %v277_v28 = vpop.xlane.xlu1 %276  ;;  %v496_v29 = vpack.c.bf16 %v445_v62, %v444_v12 }
  0xcf   :  { %v275_v13 = vpop.xlane.xlu0 %274  ;;  %v732_v22 = vpop.eup %731  ;;  %v347_v30 = vmax.f32 %v277_v28, 1e-24  ;;  %v477_v1 = vmul.f32 %v730_v38, %v970_v36 }
  0xd0   :  { %v346_v0 = vmax.f32 %v275_v13, 1e-24  ;;  %654 = vmatprep.subr.bf16.mxu0 %v496_v29  ;;  %v476_v2 = vmul.f32 %v732_v22, %v972_v37 }
  0xd1   :  { %745 = vrsqrt.f32 %v347_v30 }
  0xd2   :  { %v734_v5 = vpop.eup %733  ;;  %747 = vrsqrt.f32 %v346_v0  ;;  %v181_v32 = vpop.xlane.xlu1 %180  ;;  %v512_v33 = vpack.c.bf16 %v477_v1, %v476_v2 }
  0xd3   :  { %v179_v16 = vpop.xlane.xlu0 %178  ;;  %v736_v59 = vpop.eup %735  ;;  %v299_v17 = vmax.f32 %v181_v32, 1e-24  ;;  %v429_v8 = vmul.f32 %v734_v5, %v978_v40 }
  0xd4   :  { %v298_v23 = vmax.f32 %v179_v16, 1e-24  ;;  %672 = vmatprep.subr.bf16.mxu1 %v512_v33  ;;  %v428_v63 = vmul.f32 %v736_v59, %v980_v41 }
  0xd5   :  { %749 = vrsqrt.f32 %v299_v17 }
  0xd6   :  { %v738_v7 = vpop.eup %737  ;;  %751 = vrsqrt.f32 %v298_v23  ;;  %v245_v36 = vpop.xlane.xlu1 %244  ;;  %v488_v37 = vpack.c.bf16 %v429_v8, %v428_v63 }
  0xd7   :  { %v243_v14 = vpop.xlane.xlu0 %242  ;;  %v740_v58 = vpop.eup %739  ;;  %v331_v20 = vmax.f32 %v245_v36, 1e-24  ;;  %v461_v21 = vmul.f32 %v738_v7, %v986_v44 }
  0xd8   :  { %v330_v9 = vmax.f32 %v243_v14, 1e-24  ;;  %655 = vmatpush3.bf16.xpose.msra.mxu0 %v488_v37  ;;  %v460_v51 = vmul.f32 %v740_v58, %v988_v45 }
  0xd9   :  { %753 = vrsqrt.f32 %v331_v20 }
  0xda   :  { %v742_v6 = vpop.eup %741  ;;  %755 = vrsqrt.f32 %v330_v9  ;;  %v209_v40 = vpop.xlane.xlu1 %208  ;;  %v504_v41 = vpack.c.bf16 %v461_v21, %v460_v51 }
  0xdb   :  { %v207_v39 = vpop.xlane.xlu0 %206  ;;  %v744_v31 = vpop.eup %743  ;;  %v313_v15 = vmax.f32 %v209_v40, 1e-24  ;;  %v443_v24 = vmul.f32 %v742_v6, %v994_v48 }
  0xdc   :  { %v312_v47 = vmax.f32 %v207_v39, 1e-24  ;;  %673 = vmatpush3.bf16.xpose.msra.mxu1 %v504_v41  ;;  %v442_v50 = vmul.f32 %v744_v31, %v996_v49 }
  0xdd   :  { %757 = vrsqrt.f32 %v313_v15 }
  0xde   :  { %v746_v25 = vpop.eup %745  ;;  %759 = vrsqrt.f32 %v312_v47  ;;  %v273_v44 = vpop.xlane.xlu1 %272  ;;  %v495_v45 = vpack.c.bf16 %v443_v24, %v442_v50 }
  0xdf   :  { %v271_v46 = vpop.xlane.xlu0 %270  ;;  %v748_v54 = vpop.eup %747  ;;  %v345_v55 = vmax.f32 %v273_v44, 1e-24  ;;  %v475_v12 = vmul.f32 %v746_v25, %v1002_v52 }
  0xe0   :  { %v344_v62 = vmax.f32 %v271_v46, 1e-24  ;;  %656 = vmatprep.subr.bf16.mxu0 %v495_v45  ;;  %v474_v38 = vmul.f32 %v748_v54, %v1004_v53 }
  0xe1   :  { %761 = vrsqrt.f32 %v345_v55 }
  0xe2   :  { %v750_v28 = vpop.eup %749  ;;  %763 = vrsqrt.f32 %v344_v62  ;;  %v177_v48 = vpop.xlane.xlu1 %176  ;;  %v511_v49 = vpack.c.bf16 %v475_v12, %v474_v38 }
  0xe3   :  { %v175_v13 = vpop.xlane.xlu0 %174  ;;  %v752_v29 = vpop.eup %751  ;;  %v297_v22 = vmax.f32 %v177_v48, 1e-24  ;;  %v427_v0 = vmul.f32 %v750_v28, %v1010_v56 }
  0xe4   :  { %v296_v30 = vmax.f32 %v175_v13, 1e-24  ;;  %674 = vmatprep.subr.bf16.mxu1 %v511_v49  ;;  %v426_v1 = vmul.f32 %v752_v29, %v1012_v57 }
  0xe5   :  { %765 = vrsqrt.f32 %v297_v22 }
  0xe6   :  { %v754_v2 = vpop.eup %753  ;;  %767 = vrsqrt.f32 %v296_v30  ;;  %v241_v52 = vpop.xlane.xlu1 %240  ;;  %v487_v53 = vpack.c.bf16 %v427_v0, %v426_v1 }
  0xe7   :  { %v239_v5 = vpop.xlane.xlu0 %238  ;;  %v756_v32 = vpop.eup %755  ;;  %v329_v16 = vmax.f32 %v241_v52, 1e-24  ;;  %v459_v59 = vmul.f32 %v754_v2, %v1018_v60 }
  0xe8   :  { %v328_v33 = vmax.f32 %v239_v5, 1e-24  ;;  %657 = vmatpush3.bf16.xpose.msra.mxu0 %v487_v53  ;;  %v458_v17 = vmul.f32 %v756_v32, %v1020_v61 }
  0xe9   :  { %769 = vrsqrt.f32 %v329_v16 }
  0xea   :  { %v758_v23 = vpop.eup %757  ;;  %771 = vrsqrt.f32 %v328_v33  ;;  %v205_v56 = vpop.xlane.xlu1 %204  ;;  %v503_v57 = vpack.c.bf16 %v459_v59, %v458_v17  ;;  %v1284_v17 = vld [vmem:[#allocation8_spill] sm:$0xff] }
  0xeb   :  { %v203_v8 = vpop.xlane.xlu0 %202  ;;  %v760_v63 = vpop.eup %759  ;;  %v311_v7 = vmax.f32 %v205_v56, 1e-24  ;;  %v441_v14 = vmul.f32 %v758_v23, %v1026_v3  ;;  %v1285_v56 = vld [vmem:[#allocation9_spill] sm:$0xff] }
  0xec   :  { %v310_v36 = vmax.f32 %v203_v8, 1e-24  ;;  %675 = vmatpush3.bf16.xpose.msra.mxu1 %v503_v57  ;;  %v440_v37 = vmul.f32 %v760_v63, %v1028_v4 }
  0xed   :  { %773 = vrsqrt.f32 %v311_v7 }
  0xee   :  { %v762_v58 = vpop.eup %761  ;;  %775 = vrsqrt.f32 %v310_v36  ;;  %v269_v60 = vpop.xlane.xlu1 %268  ;;  %v494_v61 = vpack.c.bf16 %v441_v14, %v440_v37  ;;  %v1286_v37 = vld [vmem:[#allocation10_spill] sm:$0xff] }
  0xef   :  { %v267_v20 = vpop.xlane.xlu0 %266  ;;  %v764_v9 = vpop.eup %763  ;;  %v343_v21 = vmax.f32 %v269_v60, 1e-24  ;;  %v473_v6 = vmul.f32 %v762_v58, %v1034_v10  ;;  %v1287_v60 = vld [vmem:[#allocation11_spill] sm:$0xff] }
  0xf0   :  { %v342_v51 = vmax.f32 %v267_v20, 1e-24  ;;  %658 = vmatprep.subr.bf16.mxu0 %v494_v61  ;;  %v472_v40 = vmul.f32 %v764_v9, %v1036_v11 }
  0xf1   :  { %777 = vrsqrt.f32 %v343_v21 }
  0xf2   :  { %v766_v39 = vpop.eup %765  ;;  %779 = vrsqrt.f32 %v342_v51  ;;  %v173_v3 = vpop.xlane.xlu1 %172  ;;  %v510_v4 = vpack.c.bf16 %v473_v6, %v472_v40 }
  0xf3   :  { %v171_v41 = vpop.xlane.xlu0 %170  ;;  %v768_v31 = vpop.eup %767  ;;  %v295_v15 = vmax.f32 %v173_v3, 1e-24  ;;  %v425_v24 = vmul.f32 %v766_v39, %v1042_v18  ;;  %v1288_v3 = vld [vmem:[#allocation12_spill] sm:$0xff] }
  0xf4   :  { %v294_v47 = vmax.f32 %v171_v41, 1e-24  ;;  %676 = vmatprep.subr.bf16.mxu1 %v510_v4  ;;  %v424_v50 = vmul.f32 %v768_v31, %v1044_v19  ;;  %v1289_v4 = vld [vmem:[#allocation13_spill] sm:$0xff] }
  0xf5   :  { %781 = vrsqrt.f32 %v295_v15 }
  0xf6   :  { %v770_v25 = vpop.eup %769  ;;  %783 = vrsqrt.f32 %v294_v47  ;;  %v237_v10 = vpop.xlane.xlu1 %236  ;;  %v486_v11 = vpack.c.bf16 %v425_v24, %v424_v50 }
  0xf7   :  { %v235_v44 = vpop.xlane.xlu0 %234  ;;  %v772_v46 = vpop.eup %771  ;;  %v327_v45 = vmax.f32 %v237_v10, 1e-24  ;;  %v457_v55 = vmul.f32 %v770_v25, %v1050_v26 }
  0xf8   :  { %v326_v54 = vmax.f32 %v235_v44, 1e-24  ;;  %659 = vmatpush3.bf16.xpose.msra.mxu0 %v486_v11  ;;  %v456_v62 = vmul.f32 %v772_v46, %v1052_v27  ;;  %v1290_v11 = vld [vmem:[#allocation14_spill] sm:$0xff] }
  0xf9   :  { %785 = vrsqrt.f32 %v327_v45  ;;  %v1291_v45 = vld [vmem:[#allocation15_spill] sm:$0xff] }
  0xfa   :  { %v774_v12 = vpop.eup %773  ;;  %787 = vrsqrt.f32 %v326_v54  ;;  %v201_v18 = vpop.xlane.xlu1 %200  ;;  %v502_v19 = vpack.c.bf16 %v457_v55, %v456_v62 }
  0xfb   :  { %v199_v38 = vpop.xlane.xlu0 %198  ;;  %v776_v28 = vpop.eup %775  ;;  %v309_v48 = vmax.f32 %v201_v18, 1e-24  ;;  %v439_v49 = vmul.f32 %v774_v12, %v1058_v34 }
  0xfc   :  { %v308_v13 = vmax.f32 %v199_v38, 1e-24  ;;  %677 = vmatpush3.bf16.xpose.msra.mxu1 %v502_v19  ;;  %v438_v29 = vmul.f32 %v776_v28, %v1060_v35 }
  0xfd   :  { %789 = vrsqrt.f32 %v309_v48  ;;  %v1292_v48 = vld [vmem:[#allocation16_spill] sm:$0xff] }
  0xfe   :  { %v778_v22 = vpop.eup %777  ;;  %791 = vrsqrt.f32 %v308_v13  ;;  %v265_v26 = vpop.xlane.xlu1 %264  ;;  %v493_v27 = vpack.c.bf16 %v439_v49, %v438_v29  ;;  %v1293_v49 = vld [vmem:[#allocation17_spill] sm:$0xff] }
  0xff   :  { %v263_v30 = vpop.xlane.xlu0 %262  ;;  %v780_v0 = vpop.eup %779  ;;  %v341_v1 = vmax.f32 %v265_v26, 1e-24  ;;  %v471_v52 = vmul.f32 %v778_v22, %v1066_v42 }
 0x100   :  { %v340_v2 = vmax.f32 %v263_v30, 1e-24  ;;  %660 = vmatprep.subr.bf16.mxu0 %v493_v27  ;;  %v470_v5 = vmul.f32 %v780_v0, %v1068_v43 }
 0x101   :  { %793 = vrsqrt.f32 %v341_v1 }
 0x102   :  { %v782_v53 = vpop.eup %781  ;;  %795 = vrsqrt.f32 %v340_v2  ;;  %v169_v34 = vpop.xlane.xlu1 %168  ;;  %v509_v35 = vpack.c.bf16 %v471_v52, %v470_v5  ;;  %v1294_v52 = vld [vmem:[#allocation18_spill] sm:$0xff] }
 0x103   :  { %v167_v32 = vpop.xlane.xlu0 %166  ;;  %v784_v16 = vpop.eup %783  ;;  %v293_v33 = vmax.f32 %v169_v34, 1e-24  ;;  %v423_v23 = vmul.f32 %v782_v53, %v1284_v17  ;;  %v1295_v53 = vld [vmem:[#allocation19_spill] sm:$0xff]  ;;  %v1297_v17 = vld [vmem:[#allocation21_spill] sm:$0xff] }
 0x104   :  { %v292_v59 = vmax.f32 %v167_v32, 1e-24  ;;  %678 = vmatprep.subr.bf16.mxu1 %v509_v35  ;;  %v422_v8 = vmul.f32 %v784_v16, %v1285_v56 }
 0x105   :  { %797 = vrsqrt.f32 %v293_v33  ;;  %v1296_v33 = vld [vmem:[#allocation20_spill] sm:$0xff] }
 0x106   :  { %v786_v57 = vpop.eup %785  ;;  %799 = vrsqrt.f32 %v292_v59  ;;  %v233_v42 = vpop.xlane.xlu1 %232  ;;  %v485_v43 = vpack.c.bf16 %v423_v23, %v422_v8 }
 0x107   :  { %v231_v63 = vpop.xlane.xlu0 %230  ;;  %v788_v7 = vpop.eup %787  ;;  %v325_v36 = vmax.f32 %v233_v42, 1e-24  ;;  %v455_v58 = vmul.f32 %v786_v57, %v1286_v37  ;;  %v1298_v42 = vld [vmem:[#allocation22_spill] sm:$0xff] }
 0x108   :  { %v324_v14 = vmax.f32 %v231_v63, 1e-24  ;;  %661 = vmatpush3.bf16.xpose.msra.mxu0 %v485_v43  ;;  %v454_v20 = vmul.f32 %v788_v7, %v1287_v60  ;;  %v1299_v43 = vld [vmem:[#allocation23_spill] sm:$0xff] }
 0x109   :  { %801 = vrsqrt.f32 %v325_v36 }
 0x10a   :  { %v790_v61 = vpop.eup %789  ;;  %803 = vrsqrt.f32 %v324_v14  ;;  %v197_v9 = vpop.xlane.xlu1 %196  ;;  %v501_v51 = vpack.c.bf16 %v455_v58, %v454_v20  ;;  %v1300_v58 = vld [vmem:[#allocation24_spill] sm:$0xff]  ;;  %v1301_v20 = vld [vmem:[#allocation25_spill] sm:$0xff] }
 0x10b   :  { %v195_v21 = vpop.xlane.xlu0 %194  ;;  %v792_v6 = vpop.eup %791  ;;  %v307_v40 = vmax.f32 %v197_v9, 1e-24  ;;  %v437_v41 = vmul.f32 %v790_v61, %v1288_v3 }
 0x10c   :  { %v306_v39 = vmax.f32 %v195_v21, 1e-24  ;;  %679 = vmatpush3.bf16.xpose.msra.mxu1 %v501_v51  ;;  %v436_v31 = vmul.f32 %v792_v6, %v1289_v4  ;;  %v1302_v6 = vld [vmem:[#allocation26_spill] sm:$0xff]  ;;  %v1304_v4 = vld [vmem:[#allocation28_spill] sm:$0xff] }
 0x10d   :  { %805 = vrsqrt.f32 %v307_v40 }
 0x10e   :  { %v794_v15 = vpop.eup %793  ;;  %807 = vrsqrt.f32 %v306_v39  ;;  %v261_v47 = vpop.xlane.xlu1 %260  ;;  %v492_v50 = vpack.c.bf16 %v437_v41, %v436_v31  ;;  %v1303_v39 = vld [vmem:[#allocation27_spill] sm:$0xff]  ;;  %v601_v31 = vlaneseq }
 0x10f   :  { %v259_v24 = vpop.xlane.xlu0 %258  ;;  %v796_v25 = vpop.eup %795  ;;  %v339_v10 = vmax.f32 %v261_v47, 1e-24  ;;  %v469_v46 = vmul.f32 %v794_v15, %v1290_v11 }
 0x110   :  { %v338_v44 = vmax.f32 %v259_v24, 1e-24  ;;  %662 = vmatprep.subr.bf16.mxu0 %v492_v50  ;;  %v468_v54 = vmul.f32 %v796_v25, %v1291_v45  ;;  %v602_v15 = vand.u32 127, %v601_v31 }
 0x111   :  { %809 = vrsqrt.f32 %v339_v10 }
 0x112   :  { %v798_v55 = vpop.eup %797  ;;  %811 = vrsqrt.f32 %v338_v44  ;;  %v165_v62 = vpop.xlane.xlu1 %164  ;;  %v508_v18 = vpack.c.bf16 %v469_v46, %v468_v54  ;;  %v603_v24 = vadd.s32 128, %v602_v15  ;;  %v604_v25 = vadd.s32 256, %v602_v15 }
 0x113   :  { %v163_v12 = vpop.xlane.xlu0 %162  ;;  %v800_v38 = vpop.eup %799  ;;  %v291_v19 = vmax.f32 %v165_v62, 1e-24  ;;  %v421_v13 = vmul.f32 %v798_v55, %v1292_v48  ;;  %v605_v10 = vadd.s32 384, %v602_v15 }
 0x114   :  { %v290_v28 = vmax.f32 %v163_v12, 1e-24  ;;  %680 = vmatprep.subr.bf16.mxu1 %v508_v18  ;;  %v420_v29 = vmul.f32 %v800_v38, %v1293_v49 }
 0x115   :  { %813 = vrsqrt.f32 %v291_v19 }
 0x116   :  { %v802_v22 = vpop.eup %801  ;;  %815 = vrsqrt.f32 %v290_v28  ;;  %v229_v26 = vpop.xlane.xlu1 %228  ;;  %v484_v27 = vpack.c.bf16 %v421_v13, %v420_v29 }
 0x117   :  { %v227_v30 = vpop.xlane.xlu0 %226  ;;  %v804_v0 = vpop.eup %803  ;;  %v323_v1 = vmax.f32 %v229_v26, 1e-24  ;;  %v453_v5 = vmul.f32 %v802_v22, %v1294_v52 }
 0x118   :  { %v322_v2 = vmax.f32 %v227_v30, 1e-24  ;;  %663 = vmatpush3.bf16.xpose.msra.mxu0 %v484_v27  ;;  %v452_v34 = vmul.f32 %v804_v0, %v1295_v53 }
 0x119   :  { %817 = vrsqrt.f32 %v323_v1 }
 0x11a   :  { %v806_v32 = vpop.eup %805  ;;  %819 = vrsqrt.f32 %v322_v2  ;;  %v500_v35 = vpack.c.bf16 %v453_v5, %v452_v34 }
 0x11b   :  { %v808_v16 = vpop.eup %807  ;;  %v435_v59 = vmul.f32 %v806_v32, %v1296_v33 }
 0x11c   :  { %681 = vmatpush3.bf16.xpose.msra.mxu1 %v500_v35  ;;  %v434_v23 = vmul.f32 %v808_v16, %v1297_v17 }
 0x11e   :  { %v810_v56 = vpop.eup %809  ;;  %v491_v8 = vpack.c.bf16 %v435_v59, %v434_v23 }
 0x11f   :  { %v812_v57 = vpop.eup %811  ;;  %v467_v63 = vmul.f32 %v810_v56, %v1298_v42 }
 0x120   :  { %664 = vmatprep.subr.bf16.mxu0 %v491_v8  ;;  %v466_v7 = vmul.f32 %v812_v57, %v1299_v43 }
 0x122   :  { %v814_v36 = vpop.eup %813  ;;  %v507_v14 = vpack.c.bf16 %v467_v63, %v466_v7 }
 0x123   :  { %v816_v37 = vpop.eup %815  ;;  %v419_v60 = vmul.f32 %v814_v36, %v1300_v58 }
 0x124   :  { %682 = vmatprep.subr.bf16.mxu1 %v507_v14  ;;  %v418_v61 = vmul.f32 %v816_v37, %v1301_v20 }
 0x126   :  { %v818_v9 = vpop.eup %817  ;;  %v483_v21 = vpack.c.bf16 %v419_v60, %v418_v61 }
 0x127   :  { %v820_v51 = vpop.eup %819  ;;  %v451_v40 = vmul.f32 %v818_v9, %v1302_v6 }
 0x128   :  { %665 = vmatpush3.bf16.xpose.msra.mxu0 %v483_v21  ;;  %v450_v3 = vmul.f32 %v820_v51, %v1303_v39 }
 0x12a   :  { %v499_v41 = vpack.c.bf16 %v451_v40, %v450_v3 }
 0x12c   :  { %683 = vmatpush3.bf16.xpose.msra.mxu1 %v499_v41  ;;  %v608_v47 = vpop.permute.xlu0 %607  ;;  %v617_v50 = vpop.permute.xlu1 %616 }
 0x12d   :  { %vm609_vm0 = vcmp.eq.s32.totalorder %v602_v15, %v608_v47  ;;  %vm610_vm1 = vcmp.eq.s32.totalorder %v603_v24, %v608_v47  ;;  %vm611_vm2 = vcmp.eq.s32.totalorder %v604_v25, %v608_v47  ;;  %vm612_vm3 = vcmp.eq.s32.totalorder %v605_v10, %v608_v47 }
 0x12e   :  { %v619_v44 = vsel %vm609_vm0, %v617_v50, 0.0  ;;  %v620_v46 = vsel %vm610_vm1, %v617_v50, 0.0  ;;  %v621_v55 = vsel %vm611_vm2, %v617_v50, 0.0  ;;  %v622_v19 = vsel %vm612_vm3, %v617_v50, 0.0 }
 0x12f   :  { %667 = vmatmul.mubr.bf16.vlgmr.msra.gmra.mxu0 %v1304_v4 }
 0x133   :  { %685 = vmatmul.mubr.bf16.vlgmr.msra.gmra.mxu1 %v1304_v4 }
 0x1ef   :  { %v549_v11 = vpop.f32.mrf.mxu0 }
 0x1f0   :  { %v623_v45 = vsub.f32 %v549_v11, %v619_v44 }
 0x1f1   :  { %v551_v54 = vpop.f32.mrf.mxu0 }
 0x1f2   :  { %v624_v62 = vsub.f32 %v551_v54, %v620_v46  ;;  %v627_v12 = vmul.f32 64.0, %v623_v45 }
 0x1f3   :  { %v553_v18 = vpop.f32.mrf.mxu0  ;;  %v590_v38 = vpop.f32.mrf.mxu1 }
 0x1f4   :  { %v628_v28 = vmul.f32 64.0, %v624_v62  ;;  %631 = vst [vmem:[#allocation5] sm:$0xff] %v627_v12  ;;  %v625_v48 = vsub.f32 %v590_v38, %v621_v55 }
 0x1f5   :  { %v554_v13 = vpop.f32.mrf.mxu0  ;;  %v592_v49 = vpop.f32.mrf.mxu1 }
 0x1f6   :  { %632 = vst [vmem:[#allocation5 + $0x8] sm:$0xff] %v628_v28  ;;  %v629_v29 = vmul.f32 64.0, %v625_v48  ;;  %v626_v22 = vsub.f32 %v592_v49, %v622_v19 }
 0x1f7   :  { %v594_v26 = vpop.f32.mrf.mxu1 }
 0x1f8   :  { %633 = vst [vmem:[#allocation5 + $0x10] sm:$0xff] %v629_v29  ;;  %v630_v30 = vmul.f32 64.0, %v626_v22 }
 0x1f9   :  { %v595_v27 = vpop.f32.mrf.mxu1 }
 0x1fa   :  { %634 = vst [vmem:[#allocation5 + $0x18] sm:$0xff] %v630_v30 }
 0x1fb   :  { %852 = shalt.err (!%p849_p9)
}
 0x1fc   :  { %644 = dma.vmem_to_hbm [thread:$0]  %s642_s3, 512, %s1240_s4, [#allocation4]  }
 0x1fd   :  { %863 = dma.done.wait [#allocation4], 512  }
 0x1fe   :  { %864 = vsyncadd [#allocation4], 4294966784 }
 0x1ff   :  { %648 = vsyncpa [#allocation3], 1 }
 0x200   :  { %649 = vsyncpa [#allocation4], 1 }

</bundles_post_ra>
